<compile_context>
chip_gen: v5e
topology: v5e:2x2
jax: 0.10.0
libtpu: 0.0.40
codegen_flags: <defaults>
</compile_context>

<pallas_src>
import functools

import jax
import jax.numpy as jnp
from jax.experimental import pallas as pl
from jax.experimental.pallas import tpu as pltpu


def _round_up(n, m):
    return ((n + m - 1) // m) * m


def _fused_mlp_kernel(*refs, num_layers, use_bf16):
    """refs = (x, w0, b0, w1, b1, ..., w{L-1}, b{L-1}, out).

    Computes h_{i+1} = act(h_i @ W_i + b_i) layer-by-layer with everything
    resident in VMEM / vregs. ReLU after every layer except the last, which
    gets a Sigmoid (matches the nn.Sequential built by the PyTorch module).
    """
    x_ref = refs[0]
    o_ref = refs[1 + 2 * num_layers]

    h = x_ref[...]  # f32 (B_pad, in_pad)
    for i in range(num_layers):
        w = refs[1 + 2 * i][...]   # (in_pad_i, out_pad_i), f32
        b = refs[2 + 2 * i][...]   # (1, out_pad_i), f32
        if use_bf16:
            y = jnp.dot(h.astype(jnp.bfloat16), w.astype(jnp.bfloat16),
                        preferred_element_type=jnp.float32)
        else:
            y = jnp.dot(h, w, preferred_element_type=jnp.float32)
        y = y + b  # bias + activation stay in f32 on the VPU/EUP
        if i < num_layers - 1:
            h = jnp.maximum(y, 0.0)       # ReLU
        else:
            h = jax.nn.sigmoid(y)         # final Sigmoid
    o_ref[...] = h.astype(o_ref.dtype)


def neural_network_forward(x, params, *, use_bf16_matmul=True):
    """Fused forward pass in a single pallas_call.

    `params` is a list of (W, b) with W of shape (in, out) (transposed vs.
    torch) and b of shape (1, out), all float32.
    """
    B, in_dim = x.shape
    num_layers = len(params)

    # Lane-dense / sublane-aligned padding (layout plumbing only).
    b_pad = _round_up(B, 8)
    in_pad = _round_up(in_dim, 128)
    x_pad = jnp.pad(x, ((0, b_pad - B), (0, in_pad - in_dim)))

    flat_wb = []
    prev_pad = in_pad
    for (w, b) in params:
        fi, fo = w.shape
        fo_pad = _round_up(fo, 128)
        # Zero padding is semantically inert: padded input rows hit zero weight
        # rows, padded output cols get zero weight cols + zero bias (ReLU(0)=0),
        # and the final padded sigmoid cols are sliced off below.
        flat_wb.append(jnp.pad(w, ((0, prev_pad - fi), (0, fo_pad - fo))))
        flat_wb.append(jnp.pad(b, ((0, 0), (0, fo_pad - fo))))
        prev_pad = fo_pad

    out_dim = params[-1][0].shape[1]
    out_pad = prev_pad

    kernel = functools.partial(
        _fused_mlp_kernel, num_layers=num_layers, use_bf16=use_bf16_matmul)

    y_pad = pl.pallas_call(
        kernel,
        out_shape=jax.ShapeDtypeStruct((b_pad, out_pad), x.dtype),
        # No grid: everything lives in VMEM for the whole call, no pipelining.
        in_specs=[pl.BlockSpec(memory_space=pltpu.MemorySpace.VMEM)]
        * (1 + 2 * num_layers),
        out_specs=pl.BlockSpec(memory_space=pltpu.MemorySpace.VMEM),
    )(x_pad, *flat_wb)

    return y_pad[:B, :out_dim]


def init_params(key, input_size, layer_sizes):
    """PyTorch-style init: U(-1/sqrt(fan_in), +1/sqrt(fan_in)).

    Layer dims exactly as the module's nn.Sequential builds them:
      Linear(input_size, ls[0]), ReLU,
      Linear(ls[i-1], ls[i]), ReLU            for i = 1 .. len(ls)-2
      Linear(ls[-2], ls[-1]), Sigmoid
    i.e. dims = [input_size] + layer_sizes.
    Returns [(W, b)] with W of shape (in, out) — transposed vs. torch.
    """
    dims = [input_size] + list(layer_sizes)
    params = []
    for idx in range(len(dims) - 1):
        fan_in, fan_out = dims[idx], dims[idx + 1]
        key, kw, kb = jax.random.split(key, 3)
        bound = 1.0 / float(fan_in) ** 0.5
        w = jax.random.uniform(kw, (fan_in, fan_out), jnp.float32, -bound, bound)
        b = jax.random.uniform(kb, (1, fan_out), jnp.float32, -bound, bound)
        params.append((w, b))
    return params


# TODO(synk): train_model (SGD loop) and predict's numpy round() are host-side
# orchestration around this forward pass and are not translated to Pallas.


if __name__ == "__main__":
    batch = 8
    input_size = 32
    layer_sizes = [64, 32, 8]  # two hidden ReLU layers + sigmoid output of 8

    key = jax.random.PRNGKey(0)
    kx, kp = jax.random.split(key)
    x = jax.random.normal(kx, (batch, input_size), dtype=jnp.float32)
    params = init_params(kp, input_size, layer_sizes)

    fwd = jax.jit(lambda xx: neural_network_forward(xx, params))
    out = fwd(x)
    jax.block_until_ready(out)

    # Shape + sigmoid-range sanity.
    assert out.shape == (batch, layer_sizes[-1])
    assert bool(jnp.all((out >= 0.0) & (out <= 1.0)))

    # Exact-math reference (same bf16 MXU operands, f32 accumulation).
    ref = x
    for i, (w, b) in enumerate(params):
        z = jnp.dot(ref.astype(jnp.bfloat16), w.astype(jnp.bfloat16),
                    preferred_element_type=jnp.float32) + b
        ref = jax.nn.sigmoid(z) if i == len(params) - 1 else jnp.maximum(z, 0.0)
    assert bool(jnp.allclose(out, ref, atol=1e-4, rtol=1e-4))

    # Semantic sanity vs. a pure-f32 reference (bf16 rounding only difference).
    ref32 = x
    for i, (w, b) in enumerate(params):
        z = ref32 @ w + b
        ref32 = jax.nn.sigmoid(z) if i == len(params) - 1 else jnp.maximum(z, 0.0)
    assert bool(jnp.allclose(out, ref32, atol=2e-2, rtol=2e-2))

    print("KERNEL_OK")
</pallas_src>

<mosaic_0001>
module attributes {stable_mosaic.version = 11 : i64} {
  func.func @_fused_mlp_kernel(%arg0: memref<8x128xf32, #tpu.memory_space<vmem>>, %arg1: memref<128x128xf32, #tpu.memory_space<vmem>>, %arg2: memref<1x128xf32, #tpu.memory_space<vmem>>, %arg3: memref<128x128xf32, #tpu.memory_space<vmem>>, %arg4: memref<1x128xf32, #tpu.memory_space<vmem>>, %arg5: memref<128x128xf32, #tpu.memory_space<vmem>>, %arg6: memref<1x128xf32, #tpu.memory_space<vmem>>, %arg7: memref<8x128xf32, #tpu.memory_space<vmem>>) attributes {dimension_semantics = [], scalar_prefetch = 0 : i64, scratch_operands = 0 : i64, tpu.core_type = #tpu.core_type<tc>} {
    %c0 = arith.constant 0 : index
    %c0_0 = arith.constant 0 : index
    %0 = vector.load %arg0[%c0, %c0_0] : memref<8x128xf32, #tpu.memory_space<vmem>>, vector<8x128xf32>
    %c0_1 = arith.constant 0 : index
    %c0_2 = arith.constant 0 : index
    %1 = vector.load %arg1[%c0_1, %c0_2] : memref<128x128xf32, #tpu.memory_space<vmem>>, vector<128x128xf32>
    %c0_3 = arith.constant 0 : index
    %c0_4 = arith.constant 0 : index
    %2 = vector.load %arg2[%c0_3, %c0_4] : memref<1x128xf32, #tpu.memory_space<vmem>>, vector<1x128xf32>
    %3 = arith.truncf %0 : vector<8x128xf32> to vector<8x128xbf16>
    %4 = arith.truncf %1 : vector<128x128xf32> to vector<128x128xbf16>
    %cst = arith.constant dense<0.000000e+00> : vector<8x128xf32>
    %5 = tpu.matmul %3, %4, %cst {dimension_numbers = #tpu.dot_dimension_numbers<[1], [0], [0], [1], [0, 0, 1, 1], [], []>} : vector<8x128xbf16>, vector<128x128xbf16>, vector<8x128xf32> -> vector<8x128xf32>
    %6 = vector.broadcast %2 : vector<1x128xf32> to vector<8x128xf32>
    %7 = arith.addf %5, %6 : vector<8x128xf32>
    %cst_5 = arith.constant 0.000000e+00 : f32
    %8 = vector.broadcast %cst_5 : f32 to vector<8x128xf32>
    %9 = arith.maximumf %7, %8 : vector<8x128xf32>
    %c0_6 = arith.constant 0 : index
    %c0_7 = arith.constant 0 : index
    %10 = vector.load %arg3[%c0_6, %c0_7] : memref<128x128xf32, #tpu.memory_space<vmem>>, vector<128x128xf32>
    %c0_8 = arith.constant 0 : index
    %c0_9 = arith.constant 0 : index
    %11 = vector.load %arg4[%c0_8, %c0_9] : memref<1x128xf32, #tpu.memory_space<vmem>>, vector<1x128xf32>
    %12 = arith.truncf %9 : vector<8x128xf32> to vector<8x128xbf16>
    %13 = arith.truncf %10 : vector<128x128xf32> to vector<128x128xbf16>
    %cst_10 = arith.constant dense<0.000000e+00> : vector<8x128xf32>
    %14 = tpu.matmul %12, %13, %cst_10 {dimension_numbers = #tpu.dot_dimension_numbers<[1], [0], [0], [1], [0, 0, 1, 1], [], []>} : vector<8x128xbf16>, vector<128x128xbf16>, vector<8x128xf32> -> vector<8x128xf32>
    %15 = vector.broadcast %11 : vector<1x128xf32> to vector<8x128xf32>
    %16 = arith.addf %14, %15 : vector<8x128xf32>
    %cst_11 = arith.constant 0.000000e+00 : f32
    %17 = vector.broadcast %cst_11 : f32 to vector<8x128xf32>
    %18 = arith.maximumf %16, %17 : vector<8x128xf32>
    %c0_12 = arith.constant 0 : index
    %c0_13 = arith.constant 0 : index
    %19 = vector.load %arg5[%c0_12, %c0_13] : memref<128x128xf32, #tpu.memory_space<vmem>>, vector<128x128xf32>
    %c0_14 = arith.constant 0 : index
    %c0_15 = arith.constant 0 : index
    %20 = vector.load %arg6[%c0_14, %c0_15] : memref<1x128xf32, #tpu.memory_space<vmem>>, vector<1x128xf32>
    %21 = arith.truncf %18 : vector<8x128xf32> to vector<8x128xbf16>
    %22 = arith.truncf %19 : vector<128x128xf32> to vector<128x128xbf16>
    %cst_16 = arith.constant dense<0.000000e+00> : vector<8x128xf32>
    %23 = tpu.matmul %21, %22, %cst_16 {dimension_numbers = #tpu.dot_dimension_numbers<[1], [0], [0], [1], [0, 0, 1, 1], [], []>} : vector<8x128xbf16>, vector<128x128xbf16>, vector<8x128xf32> -> vector<8x128xf32>
    %24 = vector.broadcast %20 : vector<1x128xf32> to vector<8x128xf32>
    %25 = arith.addf %23, %24 : vector<8x128xf32>
    %26 = arith.negf %25 : vector<8x128xf32>
    %27 = math.exp %26 : vector<8x128xf32>
    %cst_17 = arith.constant 1.000000e+00 : f32
    %28 = vector.broadcast %cst_17 : f32 to vector<8x128xf32>
    %29 = arith.addf %28, %27 : vector<8x128xf32>
    %30 = arith.divf %28, %29 : vector<8x128xf32>
    %c0_18 = arith.constant 0 : index
    %c0_19 = arith.constant 0 : index
    %31 = vector.load %arg7[%c0_18, %c0_19] : memref<8x128xf32, #tpu.memory_space<vmem>>, vector<8x128xf32>
    tpu.vector_store %arg7[%c0_18, %c0_19], %30 {strides = array<i32>} : memref<8x128xf32, #tpu.memory_space<vmem>>, vector<8x128xf32>,
    return
  }
}

</mosaic_0001>

<bundles_post_ra>
// kernel: _lambda_.1
= control target key start
LH: loop header
LB: loop body
LE: loop exit
PB: predicated region body
PF: predicated region fallthrough
CT: control target
= control target key end

     0   :  { %12 = vsyncpa [#allocation3], 0  ;;  %s427_s0 = inlined_call_operand.vmem [shape: f32[8,128], index: 0, kind: input, shape index: {}]   ;;  %s428_s1 = inlined_call_operand.hbm [shape: f32[128,128], index: 1, kind: input, shape index: {}]   ;;  %s429_s2 = inlined_call_operand.vmem [shape: f32[1,128], index: 2, kind: input, shape index: {}]   ;;  %s430_s3 = inlined_call_operand.hbm [shape: f32[128,128], index: 3, kind: input, shape index: {}]   ;;  %s431_s4 = inlined_call_operand.vmem [shape: f32[1,128], index: 4, kind: input, shape index: {}]   ;;  %s432_s5 = inlined_call_operand.hbm [shape: f32[128,128], index: 5, kind: input, shape index: {}]   ;;  %s433_s6 = inlined_call_operand.vmem [shape: f32[1,128], index: 6, kind: input, shape index: {}]   ;;  %s434_s7 = inlined_call_operand.hbm [shape: f32[8,128], index: 7, kind: output, shape index: {}]  }
   0x1   :  { %13 = vsyncpa [#allocation6], 0 }
   0x2   :  { %14 = vsyncpa [#allocation4], 0  ;;  %s36_s26 = sshll.u32 %s430_s3, 4  ;;  %s357_s27 = smov [#allocation5]   ;;  %s37_s26 = int_to_ptr.hbm [resolvable:$true] %s36_s26 }
   0x3   :  { %s38_s28 = sshll.u32 %s357_s27, 4  ;;  %s21_s8 = sshll.u32 %s428_s1, 4  ;;  %s39_s28 = int_to_ptr.vmem [resolvable:$true] %s38_s28  ;;  %s22_s8 = int_to_ptr.hbm [resolvable:$true] %s21_s8 }
   0x4   :  { %s358_s9 = smov 128   ;;  %s359_s10 = smov 8  }
   0x5   :  { %44 = dma.hbm_to_vmem [thread:$0]  %s37_s26, 2048, %s39_s28, [#allocation6], %s358_s9, %s358_s9, %s359_s10  }
   0x6   :  { %s360_s11 = smov [#allocation2]   ;;  %s51_s15 = sshll.u32 %s432_s5, 4  ;;  %s52_s15 = int_to_ptr.hbm [resolvable:$true] %s51_s15 }
   0x7   :  { %s23_s12 = sshll.u32 %s360_s11, 4  ;;  %s361_s3 = smov [#allocation7]   ;;  %s24_s12 = int_to_ptr.vmem [resolvable:$true] %s23_s12 }
   0x8   :  { %29 = dma.hbm_to_vmem [thread:$0]  %s22_s8, 2048, %s24_s12, [#allocation3], %s358_s9, %s358_s9, %s359_s10  }
   0x9   :  { %s53_s16 = sshll.u32 %s361_s3, 4  ;;  %s54_s16 = int_to_ptr.vmem [resolvable:$true] %s53_s16 }
   0xa   :  { %59 = dma.hbm_to_vmem [thread:$0]  %s52_s15, 2048, %s54_s16, [#allocation6], %s358_s9, %s358_s9, %s359_s10  }
   0xb   :  { %351 = dma.done.wait [#allocation3], 2048  }
   0xc   :  { %352 = vsyncadd [#allocation3], 4294965248 }
   0xd   :  { %353 = dma.done.wait [#allocation6], 4096  }
   0xe   :  { %354 = vsyncadd [#allocation6], 4294963200  ;;  %v89_v0 = vld [vmem:[#allocation2 + $0x70] sm:$0xff]  ;;  %v90_v1 = vld [vmem:[#allocation2 + $0x78] sm:$0xff] }
   0xf   :  { %v87_v2 = vld [vmem:[#allocation2 + $0x60] sm:$0xff]  ;;  %v100_v3 = vpack.c.bf16 %v90_v1, %v89_v0  ;;  %v88_v4 = vld [vmem:[#allocation2 + $0x68] sm:$0xff]  ;;  %v85_v6 = vld [vmem:[#allocation2 + $0x50] sm:$0xff] }
  0x10   :  { %v99_v5 = vpack.c.bf16 %v88_v4, %v87_v2  ;;  %v86_v7 = vld [vmem:[#allocation2 + $0x58] sm:$0xff]  ;;  %v132_v8 = vld [vmem:[#allocation5 + $0x70] sm:$0xff]  ;;  %v130_v10 = vld [vmem:[#allocation5 + $0x60] sm:$0xff] }
  0x11   :  { %104 = vmatpush.bf16.msra.mxu0 %v100_v3  ;;  %v133_v9 = vld [vmem:[#allocation5 + $0x78] sm:$0xff]  ;;  %v131_v11 = vld [vmem:[#allocation5 + $0x68] sm:$0xff]  ;;  %v98_v12 = vpack.c.bf16 %v86_v7, %v85_v6  ;;  %v83_v14 = vld [vmem:[#allocation2 + $0x40] sm:$0xff] }
  0x12   :  { %v143_v13 = vpack.c.bf16 %v133_v9, %v132_v8  ;;  %v84_v15 = vld [vmem:[#allocation2 + $0x48] sm:$0xff]  ;;  %v142_v16 = vpack.c.bf16 %v131_v11, %v130_v10  ;;  %v128_v17 = vld [vmem:[#allocation5 + $0x50] sm:$0xff]  ;;  %v129_v18 = vld [vmem:[#allocation5 + $0x58] sm:$0xff] }
  0x13   :  { %v97_v19 = vpack.c.bf16 %v84_v15, %v83_v14  ;;  %v81_v20 = vld [vmem:[#allocation2 + $0x30] sm:$0xff]  ;;  %v82_v21 = vld [vmem:[#allocation2 + $0x38] sm:$0xff]  ;;  %v141_v22 = vpack.c.bf16 %v129_v18, %v128_v17  ;;  %v126_v23 = vld [vmem:[#allocation5 + $0x40] sm:$0xff] }
  0x14   :  { %147 = vmatpush.bf16.msra.mxu1 %v143_v13  ;;  %v127_v24 = vld [vmem:[#allocation5 + $0x48] sm:$0xff]  ;;  %v96_v25 = vpack.c.bf16 %v82_v21, %v81_v20  ;;  %v79_v26 = vld [vmem:[#allocation2 + $0x20] sm:$0xff]  ;;  %v124_v29 = vld [vmem:[#allocation5 + $0x30] sm:$0xff] }
  0x15   :  { %105 = vmatpush.bf16.msra.mxu0 %v99_v5  ;;  %v80_v27 = vld [vmem:[#allocation2 + $0x28] sm:$0xff]  ;;  %v140_v28 = vpack.c.bf16 %v127_v24, %v126_v23  ;;  %v125_v30 = vld [vmem:[#allocation5 + $0x38] sm:$0xff]  ;;  %v77_v32 = vld [vmem:[#allocation2 + $0x10] sm:$0xff] }
  0x16   :  { %v95_v31 = vpack.c.bf16 %v80_v27, %v79_v26  ;;  %v78_v33 = vld [vmem:[#allocation2 + $0x18] sm:$0xff]  ;;  %v139_v34 = vpack.c.bf16 %v125_v30, %v124_v29  ;;  %v122_v35 = vld [vmem:[#allocation5 + $0x20] sm:$0xff]  ;;  %v123_v36 = vld [vmem:[#allocation5 + $0x28] sm:$0xff] }
  0x17   :  { %v94_v37 = vpack.c.bf16 %v78_v33, %v77_v32  ;;  %v75_v38 = vld [vmem:[#allocation2] sm:$0xff]  ;;  %v76_v39 = vld [vmem:[#allocation2 + $0x8] sm:$0xff]  ;;  %v138_v40 = vpack.c.bf16 %v123_v36, %v122_v35  ;;  %v120_v44 = vld [vmem:[#allocation5 + $0x10] sm:$0xff] }
  0x18   :  { %148 = vmatpush.bf16.msra.mxu1 %v142_v16  ;;  %v93_v41 = vpack.c.bf16 %v76_v39, %v75_v38  ;;  %v74_v42 = vld [vmem:[%s427_s0] sm:$0xff]  ;;  %v121_v45 = vld [vmem:[#allocation5 + $0x18] sm:$0xff]  ;;  %v119_v48 = vld [vmem:[#allocation5 + $0x8] sm:$0xff] }
  0x19   :  { %106 = vmatpush.bf16.msra.mxu0 %v98_v12  ;;  %v92_v43 = vpack.c.bf16 %v74_v42, %v74_v42  ;;  %v137_v46 = vpack.c.bf16 %v121_v45, %v120_v44  ;;  %v118_v47 = vld [vmem:[#allocation5] sm:$0xff]  ;;  %v175_v50 = vld [vmem:[#allocation7 + $0x70] sm:$0xff]  ;;  %v176_v51 = vld [vmem:[#allocation7 + $0x78] sm:$0xff] }
  0x1a   :  { %v136_v49 = vpack.c.bf16 %v119_v48, %v118_v47  ;;  %v173_v52 = vld [vmem:[#allocation7 + $0x60] sm:$0xff]  ;;  %v186_v53 = vpack.c.bf16 %v176_v51, %v175_v50  ;;  %v174_v54 = vld [vmem:[#allocation7 + $0x68] sm:$0xff]  ;;  %v171_v56 = vld [vmem:[#allocation7 + $0x50] sm:$0xff] }
  0x1b   :  { %v185_v55 = vpack.c.bf16 %v174_v54, %v173_v52  ;;  %v172_v57 = vld [vmem:[#allocation7 + $0x58] sm:$0xff]  ;;  %v169_v59 = vld [vmem:[#allocation7 + $0x40] sm:$0xff]  ;;  %v170_v60 = vld [vmem:[#allocation7 + $0x48] sm:$0xff] }
  0x1c   :  { %149 = vmatpush.bf16.msra.mxu1 %v141_v22  ;;  %190 = vmatpush.bf16.msra.mxu2 %v186_v53  ;;  %v184_v58 = vpack.c.bf16 %v172_v57, %v171_v56  ;;  %v183_v61 = vpack.c.bf16 %v170_v60, %v169_v59  ;;  %v167_v62 = vld [vmem:[#allocation7 + $0x30] sm:$0xff]  ;;  %v168_v63 = vld [vmem:[#allocation7 + $0x38] sm:$0xff]  ;;  %v165_v1 = vld [vmem:[#allocation7 + $0x20] sm:$0xff] }
  0x1d   :  { %107 = vmatpush.bf16.msra.mxu0 %v97_v19  ;;  %v182_v0 = vpack.c.bf16 %v168_v63, %v167_v62  ;;  %v166_v2 = vld [vmem:[#allocation7 + $0x28] sm:$0xff]  ;;  %v248_v4 = vld [vmem:[%s429_s2] ss:$0 sm:$0xff]  ;;  %v163_v10 = vld [vmem:[#allocation7 + $0x10] sm:$0xff] }
  0x1e   :  { %v181_v3 = vpack.c.bf16 %v166_v2, %v165_v1  ;;  %v164_v11 = vld [vmem:[#allocation7 + $0x18] sm:$0xff]  ;;  %v161_v13 = vld [vmem:[#allocation7] sm:$0xff]  ;;  %v162_v14 = vld [vmem:[#allocation7 + $0x8] sm:$0xff] }
  0x1f   :  { %v180_v12 = vpack.c.bf16 %v164_v11, %v163_v10  ;;  %v179_v15 = vpack.c.bf16 %v162_v14, %v161_v13  ;;  %v249_v16 = vld [vmem:[%s431_s4] ss:$0 sm:$0xff]  ;;  %s362_s4 = smov [#allocation8]  }
  0x20   :  { %150 = vmatpush.bf16.msra.mxu1 %v140_v28  ;;  %191 = vmatpush.bf16.msra.mxu2 %v185_v55  ;;  %v250_v22 = vld [vmem:[%s433_s6] ss:$0 sm:$0xff]  ;;  %s228_s21 = sshll.u32 %s362_s4, 4  ;;  %s230_s6 = sshll.u32 %s434_s7, 4  ;;  %s229_s21 = int_to_ptr.vmem [resolvable:$true] %s228_s21  ;;  %s231_s6 = int_to_ptr.hbm [resolvable:$true] %s230_s6 }
  0x21   :  { %108 = vmatpush.bf16.msra.mxu0 %v96_v25 }
  0x24   :  { %151 = vmatpush.bf16.msra.mxu1 %v139_v34  ;;  %192 = vmatpush.bf16.msra.mxu2 %v184_v58 }
  0x25   :  { %109 = vmatpush.bf16.msra.mxu0 %v95_v31 }
  0x28   :  { %152 = vmatpush.bf16.msra.mxu1 %v138_v40  ;;  %193 = vmatpush.bf16.msra.mxu2 %v183_v61 }
  0x29   :  { %110 = vmatpush.bf16.msra.mxu0 %v94_v37 }
  0x2c   :  { %153 = vmatpush.bf16.msra.mxu1 %v137_v46  ;;  %194 = vmatpush.bf16.msra.mxu2 %v182_v0 }
  0x2d   :  { %111 = vmatpush.bf16.msra.mxu0 %v93_v41 }
  0x30   :  { %112 = vmatmul.bf16.vlgmr.msra.gmra.mxu0 %v92_v43  ;;  %154 = vmatpush.bf16.msra.mxu1 %v136_v49 }
  0x31   :  { %195 = vmatpush.bf16.msra.mxu2 %v181_v3 }
  0x35   :  { %196 = vmatpush.bf16.msra.mxu2 %v180_v12 }
  0x39   :  { %197 = vmatpush.bf16.msra.mxu2 %v179_v15 }
  0xad   :  { %v113_v5 = vpop.f32.mrf.mxu0 }
  0xae   :  { %v114_v6 = vadd.f32 %v248_v4, %v113_v5 }
  0xb0   :  { %v117_v7 = vmax.f32 %v114_v6, 0.0 }
  0xb2   :  { %v135_v8 = vpack.c.bf16 %v117_v7, %v117_v7 }
  0xb4   :  { %155 = vmatmul.bf16.vlgmr.msra.gmra.mxu1 %v135_v8 }
  0xb5   :  { %v115_v9 = vpop.f32.mrf.mxu0 }
 0x131   :  { %v156_v17 = vpop.f32.mrf.mxu1 }
 0x132   :  { %v157_v18 = vadd.f32 %v249_v16, %v156_v17 }
 0x134   :  { %v160_v19 = vmax.f32 %v157_v18, 0.0 }
 0x136   :  { %v178_v20 = vpack.c.bf16 %v160_v19, %v160_v19 }
 0x138   :  { %198 = vmatmul.bf16.vlgmr.msra.gmra.mxu2 %v178_v20 }
 0x139   :  { %v158_v21 = vpop.f32.mrf.mxu1 }
 0x1bb   :  { %v199_v23 = vpop.f32.mrf.mxu2 }
 0x1bc   :  { %v200_v24 = vadd.f32 %v250_v22, %v199_v23 }
 0x1be   :  { %v241_v25 = vmul.f32 -1.442695, %v200_v24 }
 0x1c0   :  { %251 = vpow2.f32 %v241_v25 }
 0x1c3   :  { %v201_v26 = vpop.f32.mrf.mxu2 }
 0x1c6   :  { %v252_v27 = vpop.eup %251 }
 0x1c7   :  { %v206_v28 = vadd.f32 1.0, %v252_v27 }
 0x1c9   :  { %253 = vrcp.f32 %v206_v28  ;;  %v218_v32 = vand.u32 2147483648, %v206_v28  ;;  %v216_v34 = vand.u32 2147483647, %v206_v28  ;;  %vm212_vm1 = vweird.f32 %v206_v28 }
 0x1cb   :  { %v219_v36 = vor.u32 1.1754944e-38, %v218_v32  ;;  %vm217_vm3 = vcmp.eq.f32.partialorder %v216_v34, 8.507059e+37 }
 0x1cf   :  { %v254_v29 = vpop.eup %253 }
 0x1d0   :  { %v208_v30 = vmul.f32 %v254_v29, %v206_v28  ;;  %vm213_vm0 = vweird.f32 %v254_v29 }
 0x1d1   :  { %vm214_vm2 = vmor %vm212_vm1, %vm213_vm0 }
 0x1d2   :  { %v209_v31 = vsub.f32 1.0, %v208_v30 }
 0x1d4   :  { %v210_v33 = vmul.f32 %v254_v29, %v209_v31 }
 0x1d6   :  { %v211_v35 = vadd.f32 %v254_v29, %v210_v33 }
 0x1d8   :  { %v215_v37 = vsel %vm214_vm2, %v254_v29, %v211_v35 }
 0x1d9   :  { %v220_v38 = vsel %vm217_vm3, %v219_v36, %v215_v37 }
 0x1da   :  { %222 = vst [vmem:[#allocation8] sm:$0xff] %v220_v38 }
 0x1db   :  { %233 = dma.vmem_to_hbm [thread:$0]  %s229_s21, 128, %s231_s6, [#allocation4]  }
 0x1dc   :  { %355 = dma.done.wait [#allocation4], 128  }
 0x1dd   :  { %356 = vsyncadd [#allocation4], 4294967168 }
 0x1de   :  { %238 = vsyncpa [#allocation3], 1 }
 0x1df   :  { %239 = vsyncpa [#allocation6], 1 }
 0x1e0   :  { %240 = vsyncpa [#allocation4], 1 }

</bundles_post_ra>
